<compile_context>
chip_gen: v6e
topology: v6e:2x2x1
jax: 0.10.0
libtpu: 0.0.40
codegen_flags: <defaults>
</compile_context>

<pallas_src>
import functools
import math

import jax
import jax.numpy as jnp
import numpy as np
from jax.experimental import pallas as pl
from jax.experimental.pallas import tpu as pltpu


def _stage_elementwise(d, loss_type):
    if loss_type == "mse":
        return d * d
    if loss_type == "l1":
        return jnp.abs(d)
    if loss_type == "smooth_l1":
        a = jnp.abs(d)
        return jnp.where(a < 1.0, 0.5 * d * d, a - 0.5)
    raise ValueError(f"Unknown loss type: {loss_type}")


def _kinematic_kernel_lane(pred_ref, target_ref, out_ref, *, stage_weights,
                           loss_type, feat_dim, total_rows, needs_tail_mask):
    """Lane-dense layout: one batch element per sublane row, T*D on lanes."""
    d = pred_ref[...].astype(jnp.float32) - target_ref[...].astype(jnp.float32)
    rows, cols = d.shape

    if needs_tail_mask:
        # Zero sublane rows of the (padded) tail block past the real batch.
        row_iota = jax.lax.broadcasted_iota(jnp.int32, (rows, 1), 0)
        global_row = pl.program_id(0) * rows + row_iota
        d = jnp.where(global_row < total_rows, d, jnp.float32(0.0))

    n_stages = len(stage_weights)
    if n_stages > 1:
        # First-frame lane mask (hoisted broadcast, computed once per block):
        # zero the rolled-in value for lanes [0, feat_dim) (frame 0).
        col_iota = jax.lax.broadcasted_iota(jnp.int32, (1, cols), 1)
        t_mask = jnp.broadcast_to(
            (col_iota >= feat_dim).astype(jnp.float32), d.shape)

    acc = jnp.zeros((rows, 1), jnp.float32)      # per-row reduced accumulator
    for i, w in enumerate(stage_weights):        # static, unrolled stage loop
        acc = acc + jnp.float32(w) * jnp.sum(
            _stage_elementwise(d, loss_type), axis=-1, keepdims=True)
        if i + 1 < n_stages:
            # temporal diff on the residual: frame t gets d[t] - d[t-1], t>=1
            d = d - t_mask * pltpu.roll(d, shift=feat_dim, axis=1)

    # Tiny final reduce of (rows,1); lane-dense (8,128) unmasked store.
    out_ref[...] = jnp.full(out_ref.shape, jnp.sum(acc), dtype=jnp.float32)


def _kinematic_kernel_sublane(pred_ref, target_ref, out_ref, *, stage_weights,
                              loss_type, frames, total_rows, needs_tail_mask):
    """Fallback layout: (B*T, D) with the temporal diff on the sublane axis."""
    d = pred_ref[...].astype(jnp.float32) - target_ref[...].astype(jnp.float32)
    rows = d.shape[0]
    row_iota = jax.lax.broadcasted_iota(jnp.int32, (rows, 1), 0)

    if needs_tail_mask:
        global_row = pl.program_id(0) * rows + row_iota
        d = jnp.where(global_row < total_rows, d, jnp.float32(0.0))

    n_stages = len(stage_weights)
    if n_stages > 1:
        # First-frame mask (also prevents leakage between batch elements
        # folded onto the sublane axis). Hoisted broadcast.
        t_mask = jnp.broadcast_to(
            (row_iota % frames != 0).astype(jnp.float32), d.shape)

    acc = jnp.zeros((rows, 1), jnp.float32)
    for i, w in enumerate(stage_weights):
        acc = acc + jnp.float32(w) * jnp.sum(
            _stage_elementwise(d, loss_type), axis=-1, keepdims=True)
        if i + 1 < n_stages:
            d = d - t_mask * pltpu.roll(d, shift=1, axis=0)

    out_ref[...] = jnp.full(out_ref.shape, jnp.sum(acc), dtype=jnp.float32)


def _choose_lane_block_batch(B, cols, target_elems):
    """Batch elements per block for the (B, T*D) lane-dense layout."""
    b_max = max(1, int(target_elems // cols))
    b_blk = min(B, b_max)
    if b_blk >= B:
        if B >= 16:
            b_blk = -(-B // 2)          # at least 2 blocks (v7x megacore)
        else:
            return B
    b_blk = (b_blk // 8) * 8            # (8,128) sublane constraint
    if b_blk < 8 or b_blk >= B:
        return B
    for cand in range(b_blk, 7, -8):    # prefer a divisor of B (no tail mask)
        if B % cand == 0:
            return cand
    return b_blk


def _choose_sublane_block_batch(B, T, D, target_elems):
    """Batch elements per block for the (B*T, D) fallback layout."""
    base = 8 // math.gcd(8, T)          # smallest b with (b*T) % 8 == 0
    budget_b = max(1, int(target_elems // (T * D)))
    if budget_b >= B:
        return B
    b_blk = max(base, (budget_b // base) * base)
    if b_blk >= B:
        return B
    for cand in range(b_blk, base - 1, -base):   # prefer a divisor of B
        if B % cand == 0:
            return cand
    return b_blk


def kinematic_loss(pred, target, *, loss_weight=(1.0,), loss_type="mse",
                   reduction="mean", block_batch=None,
                   target_block_elems=1 << 20, layout=None):
    """Pallas KinematicLoss forward (weight=None, avg_factor=None)."""
    # TODO(synk): 'none' reduction (elementwise loss-map output) and the
    # per-element `weight` / `avg_factor` args are not wired into the kernel;
    # the default module config is covered.
    assert reduction in ("mean", "sum")
    assert loss_type in ("mse", "l1", "smooth_l1")
    B, T, D = pred.shape
    assert target.shape == (B, T, D)

    itemsize = jnp.dtype(pred.dtype).itemsize
    cols_lane = T * D
    if layout is None:
        layout = "lane" if cols_lane <= target_block_elems else "sublane"
    assert layout in ("lane", "sublane")

    stage_weights = tuple(float(w) for w in loss_weight)

    if layout == "lane":
        pred2 = pred.reshape(B, cols_lane)       # free, contiguous reshape
        target2 = target.reshape(B, cols_lane)
        if block_batch is not None:
            b_blk = int(block_batch)
            assert b_blk == B or b_blk % 8 == 0, (
                "lane layout: block_batch must be a multiple of 8 or == batch")
        else:
            b_blk = _choose_lane_block_batch(B, cols_lane, target_block_elems)
        rows, cols = b_blk, cols_lane
        kernel = functools.partial(
            _kinematic_kernel_lane, stage_weights=stage_weights,
            loss_type=loss_type, feat_dim=D, total_rows=B,
            needs_tail_mask=(B % b_blk != 0))
    else:
        pred2 = pred.reshape(B * T, D)
        target2 = target.reshape(B * T, D)
        if block_batch is not None:
            b_blk = int(block_batch)
            assert b_blk == B or (b_blk * T) % 8 == 0, (
                "sublane layout: block_batch*T must be a multiple of 8 or "
                "block_batch == batch")
        else:
            b_blk = _choose_sublane_block_batch(B, T, D, target_block_elems)
        rows, cols = b_blk * T, D
        kernel = functools.partial(
            _kinematic_kernel_sublane, stage_weights=stage_weights,
            loss_type=loss_type, frames=T, total_rows=B * T,
            needs_tail_mask=(B % b_blk != 0))

    num_blocks = pl.cdiv(B, b_blk)

    # Explicit VMEM budget: 2 inputs x 2 pipeline buffers + f32 intermediates
    # (d, mask, roll/elementwise temps).  Clamp under v7x's 64 MiB physical.
    cols_pad = -(-cols // 128) * 128
    rows_pad = -(-rows // 8) * 8
    tile_in = rows_pad * cols_pad * itemsize
    tile_f32 = rows_pad * cols_pad * 4
    vmem_need = 4 * tile_in + 6 * tile_f32 + (4 << 20)
    vmem_limit = int(min(max(vmem_need, 32 << 20), 56 << 20))

    n_elem = B * T * D
    cost = pl.CostEstimate(
        flops=int(3 * len(stage_weights) * n_elem),
        transcendentals=0,
        bytes_accessed=int(2 * n_elem * itemsize + num_blocks * 8 * 128 * 4))

    out = pl.pallas_call(
        kernel,
        out_shape=jax.ShapeDtypeStruct((num_blocks, 8, 128), jnp.float32),
        grid_spec=pltpu.PrefetchScalarGridSpec(
            num_scalar_prefetch=0,
            grid=(num_blocks,),
            in_specs=[
                pl.BlockSpec((rows, cols), lambda i: (i, 0)),
                pl.BlockSpec((rows, cols), lambda i: (i, 0)),
            ],
            # Per-block partial sums -> no loop-carried accumulator; grid axis
            # can be sharded across TensorCores (v7x megacore).
            out_specs=pl.BlockSpec((None, 8, 128), lambda i: (i, 0, 0)),
        ),
        compiler_params=pltpu.CompilerParams(
            dimension_semantics=("parallel",),
            vmem_limit_bytes=vmem_limit),
        cost_estimate=cost,
    )(pred2, target2)

    total = jnp.sum(out[:, 0, 0])   # f32 reduction of per-block partials
    if reduction == "mean":
        total = total / jnp.float32(n_elem)
    return total


def kinematic_loss_ref(pred, target, loss_weight, reduction="mean",
                       loss_type="mse"):
    """Pure-JAX reference mirroring the PyTorch forward."""
    p = pred.astype(jnp.float32)
    t = target.astype(jnp.float32)
    total = jnp.float32(0.0)
    for w in loss_weight:
        d = p - t
        if loss_type == "mse":
            elt = d * d
        elif loss_type == "l1":
            elt = jnp.abs(d)
        else:
            a = jnp.abs(d)
            elt = jnp.where(a < 1.0, 0.5 * d * d, a - 0.5)
        stage = elt.mean() if reduction == "mean" else elt.sum()
        total = total + jnp.float32(w) * stage
        p = jnp.concatenate([p[:, :1, :], p[:, 1:] - p[:, :-1]], axis=1)
        t = jnp.concatenate([t[:, :1, :], t[:, 1:] - t[:, :-1]], axis=1)
    return total


if __name__ == "__main__":
    loss_weight = (1.0, 0.5, 0.25)   # deterministic "parameters" from __init__
    key = jax.random.PRNGKey(0)
    k1, k2, k3, k4, k5, k6 = jax.random.split(key, 6)

    # Test 1: default config (mse / mean), small shape batch=2, seq=8, hidden=32
    # -> lane-dense layout, single block.
    B, T, D = 2, 8, 32
    pred = jax.random.normal(k1, (B, T, D), dtype=jnp.float32)
    target = jax.random.normal(k2, (B, T, D), dtype=jnp.float32)
    out = jax.block_until_ready(
        kinematic_loss(pred, target, loss_weight=loss_weight, reduction="mean"))
    ref = kinematic_loss_ref(pred, target, loss_weight, reduction="mean")
    np.testing.assert_allclose(np.asarray(out), np.asarray(ref),
                               rtol=1e-5, atol=1e-6)

    # Test 1b: the other loss types on the same inputs.
    for lt in ("smooth_l1", "l1"):
        o = jax.block_until_ready(
            kinematic_loss(pred, target, loss_weight=loss_weight,
                           loss_type=lt, reduction="mean"))
        r = kinematic_loss_ref(pred, target, loss_weight, reduction="mean",
                               loss_type=lt)
        np.testing.assert_allclose(np.asarray(o), np.asarray(r),
                                   rtol=1e-5, atol=1e-6)

    # Test 2: bf16 inputs, multi-block lane layout with tail masking
    # (B=20 not divisible by block_batch=8).
    B2 = 20
    pred2 = jax.random.normal(k3, (B2, T, D), dtype=jnp.bfloat16)
    target2 = jax.random.normal(k4, (B2, T, D), dtype=jnp.bfloat16)
    out2 = jax.block_until_ready(
        kinematic_loss(pred2, target2, loss_weight=loss_weight,
                       reduction="sum", block_batch=8))
    ref2 = kinematic_loss_ref(pred2, target2, loss_weight, reduction="sum")
    np.testing.assert_allclose(np.asarray(out2), np.asarray(ref2),
                               rtol=2e-4, atol=1e-2)

    # Test 3: sublane fallback layout, multi-block + tail masking.
    B3 = 5
    pred3 = jax.random.normal(k5, (B3, T, D), dtype=jnp.float32)
    target3 = jax.random.normal(k6, (B3, T, D), dtype=jnp.float32)
    out3 = jax.block_until_ready(
        kinematic_loss(pred3, target3, loss_weight=loss_weight,
                       reduction="sum", block_batch=2, layout="sublane"))
    ref3 = kinematic_loss_ref(pred3, target3, loss_weight, reduction="sum")
    np.testing.assert_allclose(np.asarray(out3), np.asarray(ref3),
                               rtol=1e-5, atol=1e-5)

    print("KERNEL_OK")
</pallas_src>

<mosaic_0001>
module attributes {stable_mosaic.version = 11 : i64} {
  func.func @_kinematic_kernel_lane(%arg0: i32, %arg1: memref<2x256xf32, #tpu.memory_space<vmem>>, %arg2: memref<2x256xf32, #tpu.memory_space<vmem>>, %arg3: memref<1x8x128xf32, #tpu.memory_space<vmem>>) attributes {dimension_semantics = [#tpu.dimension_semantics<parallel>], iteration_bounds = array<i64: 1>, scalar_prefetch = 0 : i64, scratch_operands = 0 : i64, tpu.core_type = #tpu.core_type<tc>, window_params = [{transform_indices = @transform_0, window_bounds = array<i64: 2, 256>}, {transform_indices = @transform_1, window_bounds = array<i64: 2, 256>}, {transform_indices = @transform_2, window_bounds = array<i64: 1, 8, 128>}]} {
    %c0 = arith.constant 0 : index
    %c0_0 = arith.constant 0 : index
    %0 = vector.load %arg1[%c0, %c0_0] : memref<2x256xf32, #tpu.memory_space<vmem>>, vector<2x256xf32>
    %c0_1 = arith.constant 0 : index
    %c0_2 = arith.constant 0 : index
    %1 = vector.load %arg2[%c0_1, %c0_2] : memref<2x256xf32, #tpu.memory_space<vmem>>, vector<2x256xf32>
    %2 = arith.subf %0, %1 : vector<2x256xf32>
    %3 = tpu.iota {dimensions = array<i32: 1>} : vector<1x256xi32>
    %c32_i32 = arith.constant 32 : i32
    %4 = vector.broadcast %c32_i32 : i32 to vector<1x256xi32>
    %5 = arith.cmpi sge, %3, %4 : vector<1x256xi32>
    %6 = arith.extui %5 : vector<1x256xi1> to vector<1x256xi32>
    %7 = arith.sitofp %6 : vector<1x256xi32> to vector<1x256xf32>
    %8 = vector.shape_cast %7 : vector<1x256xf32> to vector<1x256xf32>
    %9 = vector.broadcast %8 : vector<1x256xf32> to vector<2x256xf32>
    %cst = arith.constant 0.000000e+00 : f32
    %10 = vector.broadcast %cst : f32 to vector<2x1xf32>
    %11 = arith.mulf %2, %2 : vector<2x256xf32>
    %cst_3 = arith.constant dense<0.000000e+00> : vector<2xf32>
    %12 = vector.multi_reduction <add>, %11, %cst_3 [1] : vector<2x256xf32> to vector<2xf32>
    %13 = vector.shape_cast %12 : vector<2xf32> to vector<2x1xf32>
    %cst_4 = arith.constant 1.000000e+00 : f32
    %14 = vector.broadcast %cst_4 : f32 to vector<2x1xf32>
    %15 = arith.mulf %14, %13 : vector<2x1xf32>
    %16 = arith.addf %10, %15 : vector<2x1xf32>
    %c32_i32_5 = arith.constant 32 : i32
    %17 = tpu.dynamic_rotate %2 by %c32_i32_5 dim 1 : vector<2x256xf32>, i32 -> vector<2x256xf32>
    %18 = arith.mulf %9, %17 : vector<2x256xf32>
    %19 = arith.subf %2, %18 : vector<2x256xf32>
    %20 = arith.mulf %19, %19 : vector<2x256xf32>
    %cst_6 = arith.constant dense<0.000000e+00> : vector<2xf32>
    %21 = vector.multi_reduction <add>, %20, %cst_6 [1] : vector<2x256xf32> to vector<2xf32>
    %22 = vector.shape_cast %21 : vector<2xf32> to vector<2x1xf32>
    %cst_7 = arith.constant 5.000000e-01 : f32
    %23 = vector.broadcast %cst_7 : f32 to vector<2x1xf32>
    %24 = arith.mulf %23, %22 : vector<2x1xf32>
    %25 = arith.addf %16, %24 : vector<2x1xf32>
    %c32_i32_8 = arith.constant 32 : i32
    %26 = tpu.dynamic_rotate %19 by %c32_i32_8 dim 1 : vector<2x256xf32>, i32 -> vector<2x256xf32>
    %27 = arith.mulf %9, %26 : vector<2x256xf32>
    %28 = arith.subf %19, %27 : vector<2x256xf32>
    %29 = arith.mulf %28, %28 : vector<2x256xf32>
    %cst_9 = arith.constant dense<0.000000e+00> : vector<2xf32>
    %30 = vector.multi_reduction <add>, %29, %cst_9 [1] : vector<2x256xf32> to vector<2xf32>
    %31 = vector.shape_cast %30 : vector<2xf32> to vector<2x1xf32>
    %cst_10 = arith.constant 2.500000e-01 : f32
    %32 = vector.broadcast %cst_10 : f32 to vector<2x1xf32>
    %33 = arith.mulf %32, %31 : vector<2x1xf32>
    %34 = arith.addf %25, %33 : vector<2x1xf32>
    %35 = vector.shape_cast %34 : vector<2x1xf32> to vector<1x2x1xf32>
    %cst_11 = arith.constant dense<0.000000e+00> : vector<1xf32>
    %36 = vector.multi_reduction <add>, %35, %cst_11 [1, 2] : vector<1x2x1xf32> to vector<1xf32>
    %37 = vector.shape_cast %36 : vector<1xf32> to vector<1x1x1xf32>
    %38 = vector.extract %37[0, 0, 0] : f32 from vector<1x1x1xf32>
    %39 = vector.broadcast %38 : f32 to vector<8x128xf32>
    %c0_12 = arith.constant 0 : index
    %c0_13 = arith.constant 0 : index
    %c0_14 = arith.constant 0 : index
    %40 = vector.load %arg3[%c0_12, %c0_13, %c0_14] : memref<1x8x128xf32, #tpu.memory_space<vmem>>, vector<1x8x128xf32>
    %41 = vector.shape_cast %40 : vector<1x8x128xf32> to vector<8x128xf32>
    %42 = vector.shape_cast %39 : vector<8x128xf32> to vector<1x8x128xf32>
    tpu.vector_store %arg3[%c0_12, %c0_13, %c0_14], %42 {strides = array<i32>} : memref<1x8x128xf32, #tpu.memory_space<vmem>>, vector<1x8x128xf32>,
    return
  }
  func.func @transform_0(%arg0: i32) -> (i32, i32) {
    %c0_i32 = arith.constant 0 : i32
    %c0_i32_0 = arith.constant 0 : i32
    return %arg0, %c0_i32 : i32, i32
  }
  func.func @transform_1(%arg0: i32) -> (i32, i32) {
    %c0_i32 = arith.constant 0 : i32
    %c0_i32_0 = arith.constant 0 : i32
    return %arg0, %c0_i32 : i32, i32
  }
  func.func @transform_2(%arg0: i32) -> (i32, i32, i32) {
    %c0_i32 = arith.constant 0 : i32
    %c0_i32_0 = arith.constant 0 : i32
    %c0_i32_1 = arith.constant 0 : i32
    return %arg0, %c0_i32, %c0_i32_0 : i32, i32, i32
  }
}

</mosaic_0001>

<bundles_post_ra>
// kernel: tpu_custom_call.1
= control target key start
LH: loop header
LB: loop body
LE: loop exit
PB: predicated region body
PF: predicated region fallthrough
CT: control target
= control target key end

     0   :  { %7 = vsyncpa [#allocation3], 0  ;;  %s312_s0 = inlined_call_operand.hbm [shape: f32[2,256], index: 0, kind: input, shape index: {}]   ;;  %s313_s1 = inlined_call_operand.hbm [shape: f32[2,256], index: 1, kind: input, shape index: {}]   ;;  %s314_s2 = inlined_call_operand.hbm [shape: f32[1,8,128], index: 2, kind: output, shape index: {}]  }
   0x1   :  { %8 = vsyncpa [#allocation6], 0 }
   0x2   :  { %9 = vsyncpa [#allocation4], 0  ;;  %s272_s9 = smov [#allocation2]   ;;  %s273_s11 = smov [#allocation5]  }
   0x3   :  { %s16_s10 = sshll.u32 %s272_s9, 4  ;;  %s26_s12 = sshll.u32 %s273_s11, 4  ;;  %s17_s10 = int_to_ptr.vmem [resolvable:$true] %s16_s10  ;;  %s27_s12 = int_to_ptr.vmem [resolvable:$true] %s26_s12 }
   0x4   :  { %s214_s13 = scalar_lea.vmem %s17_s10, 64  ;;  %p219_p1 = scmp.lt.s32.totalorder %s17_s10, %s17_s10 }
   0x5   :  { %p215_p0 = scmp.ne.s32.totalorder %s17_s10, %s214_s13  ;;  %p220_p2 = scmp.lt.s32.totalorder %s214_s13, %s214_s13 }
   0x7   :  { %p221_p3 = por %p220_p2, %p219_p1 }
   0x9   :  { %p222_p4 = pnand %p221_p3, %p215_p0 }
   0xb   :  { %225 = shalt.err (!%p222_p4)
}
   0xc   :  { %19 = dma.hbm_to_vmem [thread:$0]  %s312_s0, 64, %s17_s10, [#allocation3]  }
   0xd   :  { %s234_s16 = scalar_lea.vmem %s27_s12, 64  ;;  %p239_p6 = scmp.lt.s32.totalorder %s27_s12, %s27_s12 }
   0xe   :  { %p235_p5 = scmp.ne.s32.totalorder %s27_s12, %s234_s16  ;;  %p240_p7 = scmp.lt.s32.totalorder %s234_s16, %s234_s16 }
  0x10   :  { %p241_p8 = por %p240_p7, %p239_p6 }
  0x12   :  { %p242_p9 = pnand %p241_p8, %p235_p5 }
  0x14   :  { %245 = shalt.err (!%p242_p9)
}
  0x15   :  { %29 = dma.hbm_to_vmem [thread:$0]  %s313_s1, 64, %s27_s12, [#allocation6]  }
  0x16   :  { %266 = dma.done.wait [#allocation3], 64  }
  0x17   :  { %267 = vsyncadd [#allocation3], 4294967232 }
  0x18   :  { %268 = dma.done.wait [#allocation6], 64  }
  0x19   :  { %269 = vsyncadd [#allocation6], 4294967232  ;;  %v39_v0 = vlaneseq  ;;  %v274_v1 = vmov 1983009808   ;;  %v36_v6 = vld [vmem:[#allocation2] sm:$0xf] }
  0x1a   :  { %v51_v2 = vunpack.c.l.s4 %v274_v1  ;;  %v37_v7 = vld [vmem:[#allocation5] sm:$0xf]  ;;  %s275_s0 = smov 32   ;;  %v276_v13 = vmov 0.0   ;;  %vm60_vm2 = vcmask 1041408   ;;  %vm168_vm3 = vcmask 1024  }
  0x1b   :  { %v54_v3 = vshrl.u32 %v39_v0, 7  ;;  %v38_v8 = vsub.f32 %v36_v6, %v37_v7  ;;  %v40_v11 = vand.u32 127, %v39_v0  ;;  %s277_s1 = smov [#allocation7]  }
  0x1c   :  { %v52_v4 = vunpack.c.0.s8 %v51_v2  ;;  %s187_s19 = sshll.u32 %s277_s1, 4  ;;  %s188_s19 = int_to_ptr.vmem [resolvable:$true] %s187_s19 }
  0x1d   :  { %vm42_vm0 = vcmp.ge.s32.totalorder %v40_v11, 32  ;;  %vm82_vm1 = vcmp.lt.s32.totalorder %v40_v11, 32  ;;  %v48_v30 = vmul.f32 %v38_v8, %v38_v8  ;;  %s246_s21 = scalar_lea.vmem %s188_s19, 128  ;;  %p251_p11 = scmp.lt.s32.totalorder %s188_s19, %s188_s19 }
  0x1e   :  { %v55_v5 = vsub.s32 %v52_v4, %v54_v3  ;;  %v197_v14 = vsel %vm42_vm0, 1.0, %v276_v13  ;;  %p247_p10 = scmp.ne.s32.totalorder %s188_s19, %s246_s21  ;;  %p252_p12 = scmp.lt.s32.totalorder %s246_s21, %s246_s21 }
  0x20   :  { %v74_v9 = vrot.slane %v38_v8, %v55_v5  ;;  %v56_v31 = vrot.slane %v48_v30, %v55_v5  ;;  %p253_p13 = por %p252_p12, %p251_p11 }
  0x22   :  { %78 = vrot.lane.b32.xlu0 %v74_v9, %s275_s0  ;;  %v75_v10 = vcombine.high %v74_v9, %v74_v9  ;;  %v57_v32 = vcombine.high %v56_v31, %v56_v31  ;;  %v61_v33 = vsel %vm60_vm2, %v56_v31, 0.0  ;;  %p254_p0 = pnand %p253_p13, %p247_p10 }
  0x24   :  { %v62_v34 = vsel %vm60_vm2, %v57_v32, 0.0 }
  0x25   :  { %v63_v35 = vadd.f32 %v62_v34, %v61_v33 }
  0x26   :  { %80 = vrot.lane.b32.xlu0 %v75_v10, %s275_s0 }
  0x94   :  { %v79_v12 = vpop.permute.xlu0 %78 }
  0x98   :  { %v81_v15 = vpop.permute.xlu0 %80 }
  0x99   :  { %v84_v16 = vsel %vm82_vm1, %v81_v15, %v79_v12  ;;  %v83_v18 = vsel %vm82_vm1, %v79_v12, %v81_v15 }
  0x9a   :  { %v85_v17 = vmul.f32 %v197_v14, %v84_v16 }
  0x9c   :  { %v89_v19 = vcombine.low %v85_v17, %v83_v18 }
  0x9e   :  { %v96_v20 = vrot.slane %v89_v19, %v55_v5 }
  0xa0   :  { %v98_v21 = vsub.f32 %v38_v8, %v96_v20 }
  0xa2   :  { %v125_v22 = vrot.slane %v98_v21, %v55_v5  ;;  %v99_v23 = vmul.f32 %v98_v21, %v98_v21 }
  0xa4   :  { %129 = vrot.lane.b32.xlu1 %v125_v22, %s275_s0  ;;  %v107_v24 = vrot.slane %v99_v23, %v55_v5  ;;  %v126_v25 = vcombine.high %v125_v22, %v125_v22 }
  0xa6   :  { %v108_v26 = vcombine.high %v107_v24, %v107_v24  ;;  %v111_v27 = vsel %vm60_vm2, %v107_v24, 0.0 }
  0xa8   :  { %131 = vrot.lane.b32.xlu1 %v126_v25, %s275_s0  ;;  %v112_v28 = vsel %vm60_vm2, %v108_v26, 0.0 }
  0xa9   :  { %v113_v29 = vadd.f32 %v112_v28, %v111_v27 }
  0xab   :  { %114 = vadd.xlane.f32.xlu0 %v113_v29 }
  0xcc   :  { %64 = vadd.xlane.f32.xlu1 %v63_v35 }
 0x116   :  { %v130_v36 = vpop.permute.xlu1 %129 }
 0x11a   :  { %v132_v37 = vpop.permute.xlu1 %131 }
 0x11b   :  { %v134_v38 = vsel %vm82_vm1, %v132_v37, %v130_v36  ;;  %v133_v40 = vsel %vm82_vm1, %v130_v36, %v132_v37 }
 0x11c   :  { %v135_v39 = vmul.f32 %v197_v14, %v134_v38 }
 0x11e   :  { %v139_v41 = vcombine.low %v135_v39, %v133_v40 }
 0x120   :  { %v146_v42 = vrot.slane %v139_v41, %v55_v5 }
 0x122   :  { %v148_v43 = vsub.f32 %v98_v21, %v146_v42 }
 0x124   :  { %v149_v44 = vmul.f32 %v148_v43, %v148_v43 }
 0x126   :  { %v157_v45 = vrot.slane %v149_v44, %v55_v5 }
 0x128   :  { %v158_v46 = vcombine.high %v157_v45, %v157_v45  ;;  %v161_v47 = vsel %vm60_vm2, %v157_v45, 0.0 }
 0x12a   :  { %v162_v48 = vsel %vm60_vm2, %v158_v46, 0.0 }
 0x12b   :  { %v163_v49 = vadd.f32 %v162_v48, %v161_v47 }
 0x12d   :  { %164 = vadd.xlane.f32.xlu0 %v163_v49 }
 0x134   :  { %v115_v50 = vpop.xlane.xlu0 %114 }
 0x135   :  { %v116_v52 = vmul.f32 0.5, %v115_v50 }
 0x155   :  { %v65_v51 = vpop.xlane.xlu1 %64 }
 0x156   :  { %v117_v54 = vadd.f32 %v116_v52, %v65_v51 }
 0x1b6   :  { %v165_v53 = vpop.xlane.xlu0 %164 }
 0x1b7   :  { %v166_v55 = vmul.f32 0.25, %v165_v53 }
 0x1b9   :  { %v167_v56 = vadd.f32 %v166_v55, %v117_v54 }
 0x1bb   :  { %v169_v57 = vsel %vm168_vm3, %v167_v56, 0.0 }
 0x1bc   :  { %170 = vadd.xlane.f32.xlu0 %v169_v57 }
 0x245   :  { %v171_v58 = vpop.xlane.xlu0 %170 }
 0x246   :  { %v172_v59 = vrot.slane %v171_v58, 4 }
 0x248   :  { %v173_v60 = vadd.f32 %v172_v59, %v171_v58 }
 0x24a   :  { %v174_v61 = vrot.slane %v173_v60, 2 }
 0x24c   :  { %v175_v62 = vadd.f32 %v174_v61, %v173_v60 }
 0x24e   :  { %v176_v63 = vrot.slane %v175_v62, 1 }
 0x250   :  { %v177_v0 = vadd.f32 %v176_v63, %v175_v62 }
 0x252   :  { %198 = vpush %v177_v0 }
 0x283   :  { %s199_s20 = spop %198 }
 0x284   :  { %v179_v1 = vstv %s199_s20 }
 0x285   :  { %180 = vst [vmem:[#allocation7] sm:$0xff] %v179_v1 }
 0x286   :  { %257 = shalt.err (!%p254_p0)
}
 0x287   :  { %190 = dma.vmem_to_hbm [thread:$0]  %s188_s19, 128, %s314_s2, [#allocation4]  }
 0x288   :  { %270 = dma.done.wait [#allocation4], 128  }
 0x289   :  { %271 = vsyncadd [#allocation4], 4294967168 }
 0x28a   :  { %194 = vsyncpa [#allocation3], 1 }
 0x28b   :  { %195 = vsyncpa [#allocation6], 1 }
 0x28c   :  { %196 = vsyncpa [#allocation4], 1 }

</bundles_post_ra>
